<compile_context>
chip_gen: v7x
topology: tpu7x:2x2x1
jax: 0.10.0
libtpu: 0.0.40
codegen_flags: <defaults>
</compile_context>

<pallas_src>
import jax
import jax.numpy as jnp
from jax.experimental import pallas as pl
from jax.experimental.pallas import tpu as pltpu


def _round_up(x, m):
    return ((x + m - 1) // m) * m


def _pick_f_tile(F):
    """Lane-dense tile of the FF (inner) dim; falls back to the whole dim."""
    if F % 128 == 0:
        for tf in (512, 256, 128):
            if F % tf == 0:
                return tf
    return F


def residual_ff_kernel(x_ref, w1_ref, b1_ref, w2_ref, b2_ref, o_ref, acc_ref):
    """One (row_tile, H) output block; the FF dim F is the inner grid axis."""
    f = pl.program_id(1)
    nf = pl.num_programs(1)

    # MXU operands in native dtype (bf16 inputs -> bf16 MXU, f32 accumulate).
    x = x_ref[...]
    h = jnp.dot(x, w1_ref[...], preferred_element_type=jnp.float32)
    # Elementwise chain in f32 (portable across v5e/v6e/v7x VPU/EUP).
    h = jax.nn.gelu(h + b1_ref[...].astype(jnp.float32), approximate=True)
    y = jnp.dot(h.astype(w2_ref.dtype), w2_ref[...],
                preferred_element_type=jnp.float32)

    @pl.when(f == 0)
    def _():
        acc_ref[...] = y

    @pl.when(f > 0)
    def _():
        acc_ref[...] = acc_ref[...] + y

    @pl.when(f == nf - 1)
    def _():
        # Fused epilogue: bias + residual + downcast, single lane-dense store.
        o_ref[...] = (acc_ref[...]
                      + b2_ref[...].astype(jnp.float32)
                      + x.astype(jnp.float32)).astype(o_ref.dtype)


def residual_feedforward(x, w1, b1, w2, b2, *, row_block=256):
    """out = GELU(x @ w1 + b1) @ w2 + b2 + x, computed in a Pallas TPU kernel."""
    B, S, H = x.shape
    F = w1.shape[1]
    R = B * S

    # ---- layout plumbing (outside the kernel, once) -------------------------
    # Lane-dense hidden dim: pad H to a 128-multiple (no-op for real models).
    Hp = _round_up(H, 128)
    # Row (M) tile: fill the MXU M dim; shrink for tiny inputs (8-aligned).
    rm = min(row_block, _round_up(R, 8))
    Rp = _round_up(R, rm)
    # FF (inner) tile.
    tf = _pick_f_tile(F)
    nf = F // tf

    x2 = x.reshape(R, H)
    if Hp != H:
        x2 = jnp.pad(x2, ((0, 0), (0, Hp - H)))
        w1 = jnp.pad(w1, ((0, Hp - H), (0, 0)))
        w2 = jnp.pad(w2, ((0, 0), (0, Hp - H)))
        b2 = jnp.pad(b2, ((0, 0), (0, Hp - H)))
    if Rp != R:
        x2 = jnp.pad(x2, ((0, Rp - R), (0, 0)))

    # ---- explicit VMEM budget (double-buffered tiles + f32 accumulator) -----
    def nbytes(n, dt):
        return int(n) * jnp.dtype(dt).itemsize

    est = 2 * (nbytes(rm * Hp, x2.dtype)      # x tile
               + nbytes(Hp * tf, w1.dtype)    # w1 tile
               + nbytes(tf, b1.dtype)         # b1 tile
               + nbytes(tf * Hp, w2.dtype)    # w2 tile
               + nbytes(Hp, b2.dtype)         # b2 tile
               + nbytes(rm * Hp, x2.dtype))   # out tile
    est += rm * Hp * 4                        # accumulator scratch
    # Cap at 56 MiB so the same config is valid on v7x's 64 MiB per-TC VMEM.
    vmem_limit = int(min(56 * 1024 * 1024,
                         max(32 * 1024 * 1024, int(est * 1.5))))

    cost = pl.CostEstimate(
        flops=4 * Rp * Hp * F,                      # two GEMMs
        transcendentals=Rp * F,                     # tanh in GELU
        bytes_accessed=(nbytes(x2.size, x2.dtype)
                        + nbytes(w1.size, w1.dtype)
                        + nbytes(b1.size, b1.dtype)
                        + nbytes(w2.size, w2.dtype)
                        + nbytes(b2.size, b2.dtype)
                        + nbytes(Rp * Hp, x2.dtype)))

    out = pl.pallas_call(
        residual_ff_kernel,
        out_shape=jax.ShapeDtypeStruct((Rp, Hp), x.dtype),
        grid_spec=pltpu.PrefetchScalarGridSpec(
            num_scalar_prefetch=0,
            grid=(Rp // rm, nf),                               # (rows, F-tiles)
            in_specs=[
                pl.BlockSpec((rm, Hp), lambda i, f: (i, 0)),   # x rows
                pl.BlockSpec((Hp, tf), lambda i, f: (0, f)),   # w1 F-tile
                pl.BlockSpec((1, tf), lambda i, f: (0, f)),    # b1 F-tile
                pl.BlockSpec((tf, Hp), lambda i, f: (f, 0)),   # w2 F-tile
                pl.BlockSpec((1, Hp), lambda i, f: (0, 0)),    # b2 (constant)
            ],
            out_specs=pl.BlockSpec((rm, Hp), lambda i, f: (i, 0)),
            scratch_shapes=[pltpu.VMEM((rm, Hp), jnp.float32)],
        ),
        compiler_params=pltpu.CompilerParams(
            dimension_semantics=("parallel", "arbitrary"),
            vmem_limit_bytes=vmem_limit),
        cost_estimate=cost,
    )(x2, w1, b1, w2, b2)

    return out[:R, :H].reshape(B, S, H)


def reference(x, w1, b1, w2, b2):
    hp = jax.lax.Precision.HIGHEST
    h = jax.nn.gelu(jnp.dot(x, w1, precision=hp) + b1, approximate=True)
    return jnp.dot(h, w2, precision=hp) + b2 + x


if __name__ == "__main__":
    # --- small transformer-ish shapes: batch=2, seq=8, hidden=32, ff=64 ------
    B, S, H, F = 2, 8, 32, 64
    key = jax.random.PRNGKey(0)
    kx, k1, k2, k3, k4 = jax.random.split(key, 5)

    x = jax.random.normal(kx, (B, S, H), dtype=jnp.float32)
    w1 = jax.random.normal(k1, (H, F), dtype=jnp.float32) * 0.05
    b1 = jax.random.normal(k2, (1, F), dtype=jnp.float32) * 0.01
    w2 = jax.random.normal(k3, (F, H), dtype=jnp.float32) * 0.05
    b2 = jax.random.normal(k4, (1, H), dtype=jnp.float32) * 0.01

    out = residual_feedforward(x, w1, b1, w2, b2)
    out = jax.block_until_ready(out)
    ref = reference(x, w1, b1, w2, b2)
    assert out.shape == x.shape and out.dtype == x.dtype
    assert jnp.allclose(out, ref, atol=1e-4, rtol=1e-4), "mismatch (small)"

    # --- second config exercising F tiling (nf>1) and row-tail padding -------
    B2, S2, H2, F2 = 2, 200, 256, 1024
    kx, k1, k2, k3, k4 = jax.random.split(jax.random.PRNGKey(1), 5)
    x_b = jax.random.normal(kx, (B2, S2, H2), dtype=jnp.float32)
    w1_b = jax.random.normal(k1, (H2, F2), dtype=jnp.float32) * 0.03
    b1_b = jax.random.normal(k2, (1, F2), dtype=jnp.float32) * 0.01
    w2_b = jax.random.normal(k3, (F2, H2), dtype=jnp.float32) * 0.03
    b2_b = jax.random.normal(k4, (1, H2), dtype=jnp.float32) * 0.01

    out_b = residual_feedforward(x_b, w1_b, b1_b, w2_b, b2_b)
    out_b = jax.block_until_ready(out_b)
    ref_b = reference(x_b, w1_b, b1_b, w2_b, b2_b)
    assert out_b.shape == x_b.shape and out_b.dtype == x_b.dtype
    assert jnp.allclose(out_b, ref_b, atol=2e-3, rtol=2e-3), "mismatch (tiled)"

    print("KERNEL_OK")
</pallas_src>

<mosaic_0001>
module attributes {stable_mosaic.version = 11 : i64} {
  func.func @residual_ff_kernel(%arg0: i32, %arg1: i32, %arg2: memref<16x128xf32, #tpu.memory_space<vmem>>, %arg3: memref<128x64xf32, #tpu.memory_space<vmem>>, %arg4: memref<1x64xf32, #tpu.memory_space<vmem>>, %arg5: memref<64x128xf32, #tpu.memory_space<vmem>>, %arg6: memref<1x128xf32, #tpu.memory_space<vmem>>, %arg7: memref<16x128xf32, #tpu.memory_space<vmem>>, %arg8: memref<16x128xf32, #tpu.memory_space<vmem>>) attributes {dimension_semantics = [#tpu.dimension_semantics<parallel>, #tpu.dimension_semantics<arbitrary>], iteration_bounds = array<i64: 1, 1>, scalar_prefetch = 0 : i64, scratch_operands = 1 : i64, tpu.core_type = #tpu.core_type<tc>, window_params = [{transform_indices = @transform_0, window_bounds = array<i64: 16, 128>}, {transform_indices = @transform_1, window_bounds = array<i64: 128, 64>}, {transform_indices = @transform_2, window_bounds = array<i64: 1, 64>}, {transform_indices = @transform_3, window_bounds = array<i64: 64, 128>}, {pipeline_mode = #tpu.pipeline_mode<synchronous>, transform_indices = @transform_4, window_bounds = array<i64: 1, 128>}, {transform_indices = @transform_5, window_bounds = array<i64: 16, 128>}]} {
    %c0 = arith.constant 0 : index
    %c0_0 = arith.constant 0 : index
    %0 = vector.load %arg2[%c0, %c0_0] : memref<16x128xf32, #tpu.memory_space<vmem>>, vector<16x128xf32>
    %c0_1 = arith.constant 0 : index
    %c0_2 = arith.constant 0 : index
    %1 = vector.load %arg3[%c0_1, %c0_2] : memref<128x64xf32, #tpu.memory_space<vmem>>, vector<128x64xf32>
    %cst = arith.constant dense<0.000000e+00> : vector<16x64xf32>
    %2 = tpu.matmul %0, %1, %cst {dimension_numbers = #tpu.dot_dimension_numbers<[1], [0], [0], [1], [0, 0, 1, 1], [], []>} : vector<16x128xf32>, vector<128x64xf32>, vector<16x64xf32> -> vector<16x64xf32>
    %c0_3 = arith.constant 0 : index
    %c0_4 = arith.constant 0 : index
    %3 = vector.load %arg4[%c0_3, %c0_4] : memref<1x64xf32, #tpu.memory_space<vmem>>, vector<1x64xf32>
    %4 = vector.broadcast %3 : vector<1x64xf32> to vector<16x64xf32>
    %5 = arith.addf %2, %4 : vector<16x64xf32>
    %6 = arith.mulf %5, %5 : vector<16x64xf32>
    %7 = arith.mulf %5, %6 : vector<16x64xf32>
    %cst_5 = arith.constant 4.471500e-02 : f32
    %8 = vector.broadcast %cst_5 : f32 to vector<16x64xf32>
    %9 = arith.mulf %8, %7 : vector<16x64xf32>
    %10 = arith.addf %5, %9 : vector<16x64xf32>
    %cst_6 = arith.constant 0.797884583 : f32
    %11 = vector.broadcast %cst_6 : f32 to vector<16x64xf32>
    %12 = arith.mulf %11, %10 : vector<16x64xf32>
    %13 = math.tanh %12 : vector<16x64xf32>
    %cst_7 = arith.constant 1.000000e+00 : f32
    %14 = vector.broadcast %cst_7 : f32 to vector<16x64xf32>
    %15 = arith.addf %14, %13 : vector<16x64xf32>
    %cst_8 = arith.constant 5.000000e-01 : f32
    %16 = vector.broadcast %cst_8 : f32 to vector<16x64xf32>
    %17 = arith.mulf %16, %15 : vector<16x64xf32>
    %18 = arith.mulf %5, %17 : vector<16x64xf32>
    %c0_9 = arith.constant 0 : index
    %c0_10 = arith.constant 0 : index
    %19 = vector.load %arg5[%c0_9, %c0_10] : memref<64x128xf32, #tpu.memory_space<vmem>>, vector<64x128xf32>
    %cst_11 = arith.constant dense<0.000000e+00> : vector<16x128xf32>
    %20 = tpu.matmul %18, %19, %cst_11 {dimension_numbers = #tpu.dot_dimension_numbers<[1], [0], [0], [1], [0, 0, 1, 1], [], []>} : vector<16x64xf32>, vector<64x128xf32>, vector<16x128xf32> -> vector<16x128xf32>
    %c0_i32 = arith.constant 0 : i32
    %21 = arith.cmpi eq, %arg1, %c0_i32 : i32
    %22 = arith.extui %21 : i1 to i32
    %c0_i32_12 = arith.constant 0 : i32
    %23 = arith.cmpi ne, %22, %c0_i32_12 : i32
    scf.if %23 {
      %c0_17 = arith.constant 0 : index
      %c0_18 = arith.constant 0 : index
      %30 = vector.load %arg8[%c0_17, %c0_18] : memref<16x128xf32, #tpu.memory_space<vmem>>, vector<16x128xf32>
      tpu.vector_store %arg8[%c0_17, %c0_18], %20 {strides = array<i32>} : memref<16x128xf32, #tpu.memory_space<vmem>>, vector<16x128xf32>,
    } else {
    }
    %c0_i32_13 = arith.constant 0 : i32
    %24 = arith.cmpi sgt, %arg1, %c0_i32_13 : i32
    %25 = arith.extui %24 : i1 to i32
    %c0_i32_14 = arith.constant 0 : i32
    %26 = arith.cmpi ne, %25, %c0_i32_14 : i32
    scf.if %26 {
      %c0_17 = arith.constant 0 : index
      %c0_18 = arith.constant 0 : index
      %30 = vector.load %arg8[%c0_17, %c0_18] : memref<16x128xf32, #tpu.memory_space<vmem>>, vector<16x128xf32>
      %31 = arith.addf %30, %20 : vector<16x128xf32>
      %c0_19 = arith.constant 0 : index
      %c0_20 = arith.constant 0 : index
      %32 = vector.load %arg8[%c0_19, %c0_20] : memref<16x128xf32, #tpu.memory_space<vmem>>, vector<16x128xf32>
      tpu.vector_store %arg8[%c0_19, %c0_20], %31 {strides = array<i32>} : memref<16x128xf32, #tpu.memory_space<vmem>>, vector<16x128xf32>,
    } else {
    }
    %c0_i32_15 = arith.constant 0 : i32
    %27 = arith.cmpi eq, %arg1, %c0_i32_15 : i32
    %28 = arith.extui %27 : i1 to i32
    %c0_i32_16 = arith.constant 0 : i32
    %29 = arith.cmpi ne, %28, %c0_i32_16 : i32
    scf.if %29 {
      %c0_17 = arith.constant 0 : index
      %c0_18 = arith.constant 0 : index
      %30 = vector.load %arg8[%c0_17, %c0_18] : memref<16x128xf32, #tpu.memory_space<vmem>>, vector<16x128xf32>
      %c0_19 = arith.constant 0 : index
      %c0_20 = arith.constant 0 : index
      %31 = vector.load %arg6[%c0_19, %c0_20] : memref<1x128xf32, #tpu.memory_space<vmem>>, vector<1x128xf32>
      %32 = vector.broadcast %31 : vector<1x128xf32> to vector<16x128xf32>
      %33 = arith.addf %30, %32 : vector<16x128xf32>
      %34 = arith.addf %33, %0 : vector<16x128xf32>
      %c0_21 = arith.constant 0 : index
      %c0_22 = arith.constant 0 : index
      %35 = vector.load %arg7[%c0_21, %c0_22] : memref<16x128xf32, #tpu.memory_space<vmem>>, vector<16x128xf32>
      tpu.vector_store %arg7[%c0_21, %c0_22], %34 {strides = array<i32>} : memref<16x128xf32, #tpu.memory_space<vmem>>, vector<16x128xf32>,
    } else {
    }
    return
  }
  func.func @transform_0(%arg0: i32, %arg1: i32) -> (i32, i32) {
    %c0_i32 = arith.constant 0 : i32
    %c0_i32_0 = arith.constant 0 : i32
    return %arg0, %c0_i32 : i32, i32
  }
  func.func @transform_1(%arg0: i32, %arg1: i32) -> (i32, i32) {
    %c0_i32 = arith.constant 0 : i32
    %c0_i32_0 = arith.constant 0 : i32
    return %c0_i32, %arg1 : i32, i32
  }
  func.func @transform_2(%arg0: i32, %arg1: i32) -> (i32, i32) {
    %c0_i32 = arith.constant 0 : i32
    %c0_i32_0 = arith.constant 0 : i32
    return %c0_i32, %arg1 : i32, i32
  }
  func.func @transform_3(%arg0: i32, %arg1: i32) -> (i32, i32) {
    %c0_i32 = arith.constant 0 : i32
    %c0_i32_0 = arith.constant 0 : i32
    return %arg1, %c0_i32 : i32, i32
  }
  func.func @transform_4(%arg0: i32, %arg1: i32) -> (i32, i32) {
    %c0_i32 = arith.constant 0 : i32
    %c0_i32_0 = arith.constant 0 : i32
    %c0_i32_1 = arith.constant 0 : i32
    return %c0_i32, %c0_i32_0 : i32, i32
  }
  func.func @transform_5(%arg0: i32, %arg1: i32) -> (i32, i32) {
    %c0_i32 = arith.constant 0 : i32
    %c0_i32_0 = arith.constant 0 : i32
    return %arg0, %c0_i32 : i32, i32
  }
}

</mosaic_0001>

<bundles_post_ra>
// kernel: tpu_custom_call.1
= control target key start
LH: loop header
LB: loop body
LE: loop exit
PB: predicated region body
PF: predicated region fallthrough
CT: control target
= control target key end

     0   :  { %s577_s0 = inlined_call_operand.vmem [shape: f32[16,128], index: 0, kind: input, shape index: {}]   ;;  %s578_s1 = inlined_call_operand.vmem [shape: f32[128,64], index: 1, kind: input, shape index: {}]   ;;  %s579_s2 = inlined_call_operand.vmem [shape: f32[1,64], index: 2, kind: input, shape index: {}]   ;;  %s580_s3 = inlined_call_operand.vmem [shape: f32[64,128], index: 3, kind: input, shape index: {}]   ;;  %s581_s4 = inlined_call_operand.vmem [shape: f32[1,128], index: 4, kind: input, shape index: {}]   ;;  %s582_s5 = inlined_call_operand.hbm [shape: f32[16,128], index: 5, kind: output, shape index: {}]  }
   0x1   :  { %v23_v0 = vld [vmem:[%s578_s1] sm:$0xff]  ;;  %v24_v1 = vld [vmem:[%s578_s1 + $0x8] sm:$0xff]  ;;  %v25_v2 = vld [vmem:[%s578_s1 + $0x10] sm:$0xff] }
   0x2   :  { %v365_v3 = vpack.c.bf16 %v24_v1, %v23_v0  ;;  %v26_v4 = vld [vmem:[%s578_s1 + $0x18] sm:$0xff]  ;;  %v27_v6 = vld [vmem:[%s578_s1 + $0x20] sm:$0xff]  ;;  %v28_v7 = vld [vmem:[%s578_s1 + $0x28] sm:$0xff] }
   0x3   :  { %v369_v5 = vpack.c.bf16 %v26_v4, %v25_v2  ;;  %v373_v8 = vpack.c.bf16 %v28_v7, %v27_v6  ;;  %v498_v9 = vld [vmem:[%s577_s0] sm:$0xff]  ;;  %v29_v10 = vld [vmem:[%s578_s1 + $0x30] sm:$0xff]  ;;  %v30_v11 = vld [vmem:[%s578_s1 + $0x38] sm:$0xff] }
   0x4   :  { %366 = vmatprep.subr.bf16.mxu0 %v365_v3  ;;  %343 = vmatprep.mubr.f32.mxu0 %v498_v9 }
   0x5   :  { %368 = vmatpush3.bf16.msra.mxu0 %v365_v3 }
   0x6   :  { %370 = vmatprep.subr.bf16.mxu0 %v369_v5 }
   0x7   :  { %10 = vsyncpa [#allocation4], 0  ;;  %v377_v12 = vpack.c.bf16 %v30_v11, %v29_v10  ;;  %v31_v13 = vld [vmem:[%s578_s1 + $0x40] sm:$0xff]  ;;  %v32_v14 = vld [vmem:[%s578_s1 + $0x48] sm:$0xff]  ;;  %vm147_vm0 = vcmask 523264   ;;  %s444_s20 = smov [#allocation3]  }
   0x8   :  { %v381_v15 = vpack.c.bf16 %v32_v14, %v31_v13  ;;  %v33_v16 = vld [vmem:[%s578_s1 + $0x50] sm:$0xff]  ;;  %v34_v17 = vld [vmem:[%s578_s1 + $0x58] sm:$0xff]  ;;  %v35_v19 = vld [vmem:[%s578_s1 + $0x60] sm:$0xff]  ;;  %s268_s21 = sshll.u32 %s444_s20, 4  ;;  %s269_s21 = int_to_ptr.vmem [resolvable:$true] %s268_s21 }
   0x9   :  { %372 = vmatpush3.bf16.msra.mxu0 %v369_v5  ;;  %v385_v18 = vpack.c.bf16 %v34_v17, %v33_v16  ;;  %v36_v20 = vld [vmem:[%s578_s1 + $0x68] sm:$0xff]  ;;  %v37_v22 = vld [vmem:[%s578_s1 + $0x70] sm:$0xff]  ;;  %v38_v23 = vld [vmem:[%s578_s1 + $0x78] sm:$0xff]  ;;  %s420_s22 = scalar_lea.vmem %s269_s21, 256  ;;  %p425_p1 = scmp.lt.s32.totalorder %s269_s21, %s269_s21 }
   0xa   :  { %374 = vmatprep.subr.bf16.mxu0 %v373_v8  ;;  %v389_v21 = vpack.c.bf16 %v36_v20, %v35_v19  ;;  %v393_v24 = vpack.c.bf16 %v38_v23, %v37_v22  ;;  %v22_v25 = vld [vmem:[%s577_s0 + $0x8] sm:$0xff]  ;;  %v139_v26 = vld [vmem:[%s580_s3] sm:$0xff]  ;;  %v141_v28 = vld [vmem:[%s580_s3 + $0x10] sm:$0xff]  ;;  %p421_p0 = scmp.ne.s32.totalorder %s269_s21, %s420_s22  ;;  %p426_p2 = scmp.lt.s32.totalorder %s420_s22, %s420_s22 }
   0xb   :  { %v140_v27 = vld [vmem:[%s580_s3 + $0x8] sm:$0xff]  ;;  %v142_v30 = vld [vmem:[%s580_s3 + $0x18] sm:$0xff]  ;;  %v143_v32 = vld [vmem:[%s580_s3 + $0x20] sm:$0xff] }
   0xc   :  { %v397_v29 = vpack.c.bf16 %v140_v27, %v139_v26  ;;  %v401_v31 = vpack.c.bf16 %v142_v30, %v141_v28  ;;  %v144_v33 = vld [vmem:[%s580_s3 + $0x28] sm:$0xff]  ;;  %v145_v35 = vld [vmem:[%s580_s3 + $0x30] sm:$0xff]  ;;  %v146_v36 = vld [vmem:[%s580_s3 + $0x38] sm:$0xff]  ;;  %p427_p3 = por %p426_p2, %p425_p1 }
   0xd   :  { %376 = vmatpush3.bf16.msra.mxu0 %v373_v8  ;;  %v405_v34 = vpack.c.bf16 %v144_v33, %v143_v32  ;;  %v409_v37 = vpack.c.bf16 %v146_v36, %v145_v35  ;;  %v279_v38 = vld [vmem:[%s579_s2] ss:$0 sm:$0xff] }
   0xe   :  { %378 = vmatprep.subr.bf16.mxu0 %v377_v12  ;;  %398 = vmatprep.subr.bf16.mxu1 %v397_v29  ;;  %v282_v61 = vld [vmem:[%s581_s4] ss:$0 sm:$0xff]  ;;  %p428_p4 = pnand %p427_p3, %p421_p0 }
   0xf   :  { %400 = vmatpush3.bf16.msra.mxu1 %v397_v29 }
  0x10   :  { %402 = vmatprep.subr.bf16.mxu1 %v401_v31 }
  0x11   :  { %380 = vmatpush3.bf16.msra.mxu0 %v377_v12 }
  0x12   :  { %382 = vmatprep.subr.bf16.mxu0 %v381_v15 }
  0x13   :  { %404 = vmatpush3.bf16.msra.mxu1 %v401_v31 }
  0x14   :  { %406 = vmatprep.subr.bf16.mxu1 %v405_v34 }
  0x15   :  { %384 = vmatpush3.bf16.msra.mxu0 %v381_v15 }
  0x16   :  { %386 = vmatprep.subr.bf16.mxu0 %v385_v18 }
  0x17   :  { %408 = vmatpush3.bf16.msra.mxu1 %v405_v34 }
  0x18   :  { %410 = vmatprep.subr.bf16.mxu1 %v409_v37 }
  0x19   :  { %388 = vmatpush3.bf16.msra.mxu0 %v385_v18 }
  0x1a   :  { %390 = vmatprep.subr.bf16.mxu0 %v389_v21 }
  0x1b   :  { %412 = vmatpush3.bf16.msra.mxu1 %v409_v37 }
  0x1d   :  { %392 = vmatpush3.bf16.msra.mxu0 %v389_v21 }
  0x1e   :  { %394 = vmatprep.subr.bf16.mxu0 %v393_v24 }
  0x21   :  { %396 = vmatpush3.bf16.msra.mxu0 %v393_v24 }
  0x24   :  { %344 = vmatmul.mubr.f32.vlgmr.msra.gmra.mrb[0].mxu0 %v22_v25 }
  0xf7   :  { %v345_v39 = vpop.f32.mrb[0].mxu0 }
  0xf8   :  { %v118_v40 = vadd.f32 %v345_v39, %v279_v38  ;;  %v112_v41 = vpop.f32.mrb[1].mxu0 }
  0xf9   :  { %v113_v42 = vadd.f32 %v279_v38, %v112_v41 }
  0xfa   :  { %v122_v43 = vmul.f32 %v118_v40, %v118_v40 }
  0xfb   :  { %v121_v44 = vmul.f32 %v113_v42, %v113_v42 }
  0xfc   :  { %v124_v45 = vmul.f32 %v122_v43, %v118_v40 }
  0xfd   :  { %v123_v46 = vmul.f32 %v121_v44, %v113_v42 }
  0xfe   :  { %v126_v47 = vmul.f32 0.044715, %v124_v45 }
  0xff   :  { %v125_v48 = vmul.f32 0.044715, %v123_v46 }
 0x100   :  { %v128_v49 = vadd.f32 %v126_v47, %v118_v40 }
 0x101   :  { %v127_v50 = vadd.f32 %v125_v48, %v113_v42 }
 0x102   :  { %v130_v51 = vmul.f32 0.7978846, %v128_v49 }
 0x103   :  { %v129_v52 = vmul.f32 0.7978846, %v127_v50 }
 0x104   :  { %416 = vtanh.f32 %v130_v51 }
 0x105   :  { %418 = vtanh.f32 %v129_v52 }
 0x10e   :  { %v417_v53 = vpop.eup %416 }
 0x10f   :  { %v419_v54 = vpop.eup %418  ;;  %v134_v55 = vadd.f32 1.0, %v417_v53 }
 0x110   :  { %v133_v56 = vadd.f32 1.0, %v419_v54 }
 0x111   :  { %v136_v57 = vmul.f32 0.5, %v134_v55 }
 0x112   :  { %v135_v58 = vmul.f32 0.5, %v133_v56 }
 0x113   :  { %v138_v60 = vmul.f32 %v136_v57, %v118_v40 }
 0x114   :  { %v137_v59 = vmul.f32 %v135_v58, %v113_v42 }
 0x116   :  { %362 = vmatprep.mubr.msk.f32.mxu1 %vm147_vm0, %v137_v59 }
 0x117   :  { %363 = vmatmul.mubr.msk.f32.vlgmr.msra.gmra.mrb[0].mxu1 %vm147_vm0, %v138_v60 }
 0x1ea   :  { %v364_v62 = vpop.f32.mrb[0].mxu1 }
 0x1eb   :  { %v258_v63 = vadd.f32 %v364_v62, %v282_v61  ;;  %v220_v0 = vpop.f32.mrb[1].mxu1 }
 0x1ec   :  { %v257_v1 = vadd.f32 %v282_v61, %v220_v0 }
 0x1ed   :  { %v260_v2 = vadd.f32 %v258_v63, %v22_v25 }
 0x1ee   :  { %v259_v3 = vadd.f32 %v257_v1, %v498_v9 }
 0x1ef   :  { %262 = vst [vmem:[#allocation3 + $0x8] sm:$0xff] %v260_v2 }
 0x1f0   :  { %261 = vst [vmem:[#allocation3] sm:$0xff] %v259_v3 }
 0x1f1   :  { %431 = shalt.err (!%p428_p4)
}
 0x1f2   :  { %s432_s24 = scalar_lea.hbm %s582_s5, 256 }
 0x1f3   :  { %p433_p5 = scmp.ne.s32.totalorder %s582_s5, %s432_s24  ;;  %p436_p6 = scmp.lt.u32.totalorder %s432_s24, %s582_s5 }
 0x1f5   :  { %p438_p7 = pnand %p436_p6, %p433_p5 }
 0x1f7   :  { %441 = shalt.err (!%p438_p7)
}
 0x1f8   :  { %s445_s29 = smov 128   ;;  %s446_s30 = smov 8  }
 0x1f9   :  { %274 = dma.vmem_to_hbm [thread:$0]  %s269_s21, 256, %s582_s5, [#allocation4], %s445_s29, %s445_s29, %s446_s30  }
 0x1fa   :  { %442 = dma.done.wait [#allocation4], 256  }
 0x1fb   :  { %443 = vsyncadd [#allocation4], 4294967040 }
 0x1fc   :  { %278 = vsyncpa [#allocation4], 1 }

</bundles_post_ra>
